<compile_context>
chip_gen: v6e
topology: v6e:2x2x1
jax: 0.10.0
libtpu: 0.0.40
codegen_flags: <defaults>
</compile_context>

<pallas_src>
from functools import partial
from typing import NamedTuple, Tuple

import jax
import jax.numpy as jnp
from jax.experimental import pallas as pl
from jax.experimental.pallas import tpu as pltpu

LANE = 128      # vreg lane width
SUBLANE = 32    # row granule that is sublane-dense for every dtype (f32:8, bf16:16, int8:32)


def _cdiv(a, b):
    return -(-a // b)


def _vmem_capacity_bytes():
    # Generation-aware VMEM query; fall back to the smallest per-TC VMEM among the
    # targeted generations (v7x: 64 MiB) if the query is unavailable.
    try:
        return int(pltpu.get_tpu_info().vmem_capacity_bytes)
    except Exception:
        return 64 << 20


class BankPlan(NamedTuple):
    out_shape: Tuple[int, int, int, int]   # (O, I, K, K)
    T: int            # number of templates
    M: int            # O * I * K * K
    R: int            # ceil(M / 128) lane rows
    Rp: int           # R padded to grid_r * br
    Tp: int           # T padded to grid_t * bt
    bt: int           # templates per grid step
    br: int           # lane rows per grid step
    grid_r: int
    grid_t: int
    vmem_limit_bytes: int


def plan_template_bank(num_templates, in_planes, out_planes, kernel_size,
                       template_dtype=jnp.float32, coeff_dtype=jnp.float32,
                       *, target_input_bytes=None, block_templates=None):
    """Static tiling plan (pure Python ints -> hashable, jit-static)."""
    T = int(num_templates)
    O, I, K = int(out_planes), int(in_planes), int(kernel_size)
    M = O * I * K * K
    R = _cdiv(M, LANE)

    t_itemsize = jnp.dtype(template_dtype).itemsize
    o_itemsize = jnp.result_type(template_dtype, coeff_dtype).itemsize

    # Budget: never ask for more than 40 MiB of scoped VMEM (v7x has 64 MiB total).
    vmem_cap = min(40 << 20, (_vmem_capacity_bytes() * 5) // 8)
    if target_input_bytes is None:
        # ~8 MiB template tile per step -> double-buffered footprint ~16-20 MiB.
        target_input_bytes = min(8 << 20, vmem_cap // 5)

    # Templates per grid step.
    if block_templates is not None:
        bt = max(1, min(int(block_templates), T))
    else:
        bt = T
        # Large-T fallback: split T over a reduction grid axis instead of shrinking
        # the row blocks.
        strip = SUBLANE * LANE * t_itemsize
        if T * strip > vmem_cap // 4:
            bt = max(1, (vmem_cap // 4) // strip)
            bt = min(bt, 256)   # bound the unrolled FMA chain / trace time

    # Lane rows per grid step: ~target_input_bytes of templates, 32-row granules.
    br = target_input_bytes // max(1, bt * LANE * t_itemsize)
    if br >= R:
        br = R
    else:
        br = max(SUBLANE, (br // SUBLANE) * SUBLANE)

    grid_r = _cdiv(R, br)
    grid_t = _cdiv(T, bt)
    Rp = grid_r * br
    Tp = grid_t * bt

    footprint = (2 * bt * br * LANE * t_itemsize   # double-buffered input tile
                 + 2 * br * LANE * o_itemsize      # double-buffered output tile
                 + br * LANE * 4)                  # f32 accumulator scratch
    vmem_limit = int(min(vmem_cap, max(2 * footprint, 16 << 20)))

    return BankPlan((O, I, K, K), T, M, R, Rp, Tp, bt, br, grid_r, grid_t, vmem_limit)


def prepare_templates(templates, plan):
    """One-time layout prep (do this at parameter-init time, NOT per forward):
    (T, O, I, K, K) -> lane-dense, zero-padded (Tp, Rp, 128)."""
    T = templates.shape[0]
    t_flat = templates.reshape(T, -1)
    t_flat = jnp.pad(t_flat, ((0, plan.Tp - T), (0, plan.Rp * LANE - plan.M)))
    return t_flat.reshape(plan.Tp, plan.Rp, LANE)


def _bank_kernel(c_ref, t_ref, o_ref, acc_ref):
    # c_ref:   SMEM (Tp,)          f32 coefficients (whole zero-padded vector)
    # t_ref:   VMEM (bt, br, 128)  lane rows of the flattened templates
    # o_ref:   VMEM (br, 128)      weighted sum (output dtype), resident over T axis
    # acc_ref: VMEM (br, 128)      f32 accumulator, persists over the T grid axis
    bt = t_ref.shape[0]
    k = pl.program_id(1)
    base = k * bt

    @pl.when(k == 0)
    def _():
        acc_ref[...] = jnp.zeros_like(acc_ref)

    acc = acc_ref[...]
    for t in range(bt):  # bt is small & static -> trace-time unrolled FMA chain (VPU)
        acc = acc + c_ref[base + t] * t_ref[t].astype(jnp.float32)
    acc_ref[...] = acc

    @pl.when(k == pl.num_programs(1) - 1)
    def _():
        o_ref[...] = acc_ref[...].astype(o_ref.dtype)


@partial(jax.jit, static_argnames="plan")
def template_bank_forward(templates_prepped, coefficients, plan):
    """weights = (templates * coefficients).sum(0) for a pre-laid-out template bank."""
    out_dtype = jnp.result_type(templates_prepped.dtype, coefficients.dtype)
    c = coefficients.reshape(plan.T).astype(jnp.float32)
    if plan.Tp != plan.T:
        c = jnp.pad(c, (0, plan.Tp - plan.T))   # T scalars -- negligible

    out = pl.pallas_call(
        _bank_kernel,
        out_shape=jax.ShapeDtypeStruct((plan.Rp, LANE), out_dtype),
        grid=(plan.grid_r, plan.grid_t),
        in_specs=[
            # Whole coefficient vector resident in SMEM (scalar reads in the kernel).
            pl.BlockSpec(memory_space=pltpu.MemorySpace.SMEM),
            # (bt, br, 128) tile of the prepared templates per grid step.
            pl.BlockSpec((plan.bt, plan.br, LANE), lambda i, k: (k, i, 0)),
        ],
        out_specs=pl.BlockSpec((plan.br, LANE), lambda i, k: (i, 0)),
        scratch_shapes=[pltpu.VMEM((plan.br, LANE), jnp.float32)],
        compiler_params=pltpu.CompilerParams(
            # Row axis is independent ("parallel"); T axis is a reduction ("arbitrary").
            # On v7x, pltpu.CORE_PARALLEL on axis 0 (with grid_r a multiple of the core
            # count) would explicitly shard rows across both TensorCores.
            dimension_semantics=("parallel", "arbitrary"),
            vmem_limit_bytes=plan.vmem_limit_bytes,
        ),
        cost_estimate=pl.CostEstimate(
            flops=2 * plan.Tp * plan.Rp * LANE,
            transcendentals=0,
            bytes_accessed=int(
                plan.Tp * plan.Rp * LANE * templates_prepped.dtype.itemsize
                + plan.Rp * LANE * out_dtype.itemsize + plan.Tp * 4),
        ),
    )(c, templates_prepped)

    return out.reshape(-1)[:plan.M].reshape(plan.out_shape)


def kaiming_normal(key, shape, dtype=jnp.float32):
    # torch.nn.init.kaiming_normal_ defaults: fan_in mode, leaky_relu gain = sqrt(2)
    # shape = (out_planes, in_planes, k, k); fan_in = in_planes * k * k
    fan_in = shape[1] * shape[2] * shape[3]
    std = (2.0 / fan_in) ** 0.5
    return std * jax.random.normal(key, shape, dtype)


def _run_case(key, num_templates, in_planes, out_planes, kernel_size, **plan_kwargs):
    keys = jax.random.split(key, num_templates + 1)
    # Deterministic "parameter" init mirroring the module's __init__.
    templates = jnp.stack(
        [kaiming_normal(keys[i], (out_planes, in_planes, kernel_size, kernel_size))
         for i in range(num_templates)])                           # (T, O, I, K, K)
    # Forward input: coefficients of shape (T, 1, 1, 1, 1)
    coefficients = jax.random.normal(keys[-1],
                                     (num_templates, 1, 1, 1, 1), jnp.float32)

    plan = plan_template_bank(num_templates, in_planes, out_planes, kernel_size,
                              templates.dtype, coefficients.dtype, **plan_kwargs)
    t_prepped = prepare_templates(templates, plan)   # one-time layout (at "init")
    weights = template_bank_forward(t_prepped, coefficients, plan=plan)
    jax.block_until_ready(weights)

    # Reference check (plain JAX, same semantics as the PyTorch forward).
    ref = (templates * coefficients).sum(0)
    assert weights.shape == (out_planes, in_planes, kernel_size, kernel_size)
    assert jnp.allclose(weights, ref, atol=1e-5, rtol=1e-5)
    return weights


if __name__ == "__main__":
    key = jax.random.PRNGKey(0)
    k1, k2 = jax.random.split(key)

    # Case 1: module-sized example (whole bank handled in a single grid step).
    _run_case(k1, num_templates=4, in_planes=4, out_planes=8, kernel_size=3)

    # Case 2: exercises the tiled paths (multiple row blocks, T-reduction grid axis
    # with the f32 accumulator, and padding of both T and the lane rows) by forcing
    # small blocks on a slightly larger bank.
    _run_case(k2, num_templates=5, in_planes=16, out_planes=64, kernel_size=3,
              block_templates=2, target_input_bytes=32 << 10)

    print("KERNEL_OK")
</pallas_src>

<mosaic_0001>
module attributes {stable_mosaic.version = 11 : i64} {
  func.func @_bank_kernel(%arg0: i32, %arg1: i32, %arg2: memref<4xf32, #tpu.memory_space<smem>>, %arg3: memref<4x3x128xf32, #tpu.memory_space<vmem>>, %arg4: memref<3x128xf32, #tpu.memory_space<vmem>>, %arg5: memref<3x128xf32, #tpu.memory_space<vmem>>) attributes {dimension_semantics = [#tpu.dimension_semantics<parallel>, #tpu.dimension_semantics<arbitrary>], iteration_bounds = array<i64: 1, 1>, scalar_prefetch = 0 : i64, scratch_operands = 1 : i64, tpu.core_type = #tpu.core_type<tc>, window_params = [{transform_indices = @transform_0, window_bounds = array<i64: 4>}, {transform_indices = @transform_1, window_bounds = array<i64: 4, 3, 128>}, {transform_indices = @transform_2, window_bounds = array<i64: 3, 128>}]} {
    %c4_i32 = arith.constant 4 : i32
    %0 = arith.muli %arg1, %c4_i32 : i32
    %c0_i32 = arith.constant 0 : i32
    %1 = arith.cmpi eq, %arg1, %c0_i32 : i32
    %2 = arith.extui %1 : i1 to i32
    %c0_i32_0 = arith.constant 0 : i32
    %3 = arith.cmpi ne, %2, %c0_i32_0 : i32
    scf.if %3 {
      %cst = arith.constant 0.000000e+00 : f32
      %41 = vector.broadcast %cst : f32 to vector<3x128xf32>
      %c0_16 = arith.constant 0 : index
      %c0_17 = arith.constant 0 : index
      %42 = vector.load %arg5[%c0_16, %c0_17] : memref<3x128xf32, #tpu.memory_space<vmem>>, vector<3x128xf32>
      tpu.vector_store %arg5[%c0_16, %c0_17], %41 {strides = array<i32>} : memref<3x128xf32, #tpu.memory_space<vmem>>, vector<3x128xf32>,
    } else {
    }
    %c0 = arith.constant 0 : index
    %c0_1 = arith.constant 0 : index
    %4 = vector.load %arg5[%c0, %c0_1] : memref<3x128xf32, #tpu.memory_space<vmem>>, vector<3x128xf32>
    %c0_i32_2 = arith.constant 0 : i32
    %5 = arith.addi %0, %c0_i32_2 : i32
    %6 = arith.index_cast %5 : i32 to index
    %7 = memref.load %arg2[%6] : memref<4xf32, #tpu.memory_space<smem>>
    %c0_3 = arith.constant 0 : index
    %c0_4 = arith.constant 0 : index
    %c0_5 = arith.constant 0 : index
    %8 = vector.load %arg3[%c0_3, %c0_4, %c0_5] : memref<4x3x128xf32, #tpu.memory_space<vmem>>, vector<1x3x128xf32>
    %9 = vector.shape_cast %8 : vector<1x3x128xf32> to vector<3x128xf32>
    %10 = vector.broadcast %7 : f32 to vector<3x128xf32>
    %11 = arith.mulf %10, %9 : vector<3x128xf32>
    %12 = arith.addf %4, %11 : vector<3x128xf32>
    %c1_i32 = arith.constant 1 : i32
    %13 = arith.addi %0, %c1_i32 : i32
    %14 = arith.index_cast %13 : i32 to index
    %15 = memref.load %arg2[%14] : memref<4xf32, #tpu.memory_space<smem>>
    %c1 = arith.constant 1 : index
    %c0_6 = arith.constant 0 : index
    %c0_7 = arith.constant 0 : index
    %16 = vector.load %arg3[%c1, %c0_6, %c0_7] : memref<4x3x128xf32, #tpu.memory_space<vmem>>, vector<1x3x128xf32>
    %17 = vector.shape_cast %16 : vector<1x3x128xf32> to vector<3x128xf32>
    %18 = vector.broadcast %15 : f32 to vector<3x128xf32>
    %19 = arith.mulf %18, %17 : vector<3x128xf32>
    %20 = arith.addf %12, %19 : vector<3x128xf32>
    %c2_i32 = arith.constant 2 : i32
    %21 = arith.addi %0, %c2_i32 : i32
    %22 = arith.index_cast %21 : i32 to index
    %23 = memref.load %arg2[%22] : memref<4xf32, #tpu.memory_space<smem>>
    %c2 = arith.constant 2 : index
    %c0_8 = arith.constant 0 : index
    %c0_9 = arith.constant 0 : index
    %24 = vector.load %arg3[%c2, %c0_8, %c0_9] : memref<4x3x128xf32, #tpu.memory_space<vmem>>, vector<1x3x128xf32>
    %25 = vector.shape_cast %24 : vector<1x3x128xf32> to vector<3x128xf32>
    %26 = vector.broadcast %23 : f32 to vector<3x128xf32>
    %27 = arith.mulf %26, %25 : vector<3x128xf32>
    %28 = arith.addf %20, %27 : vector<3x128xf32>
    %c3_i32 = arith.constant 3 : i32
    %29 = arith.addi %0, %c3_i32 : i32
    %30 = arith.index_cast %29 : i32 to index
    %31 = memref.load %arg2[%30] : memref<4xf32, #tpu.memory_space<smem>>
    %c3 = arith.constant 3 : index
    %c0_10 = arith.constant 0 : index
    %c0_11 = arith.constant 0 : index
    %32 = vector.load %arg3[%c3, %c0_10, %c0_11] : memref<4x3x128xf32, #tpu.memory_space<vmem>>, vector<1x3x128xf32>
    %33 = vector.shape_cast %32 : vector<1x3x128xf32> to vector<3x128xf32>
    %34 = vector.broadcast %31 : f32 to vector<3x128xf32>
    %35 = arith.mulf %34, %33 : vector<3x128xf32>
    %36 = arith.addf %28, %35 : vector<3x128xf32>
    %c0_12 = arith.constant 0 : index
    %c0_13 = arith.constant 0 : index
    %37 = vector.load %arg5[%c0_12, %c0_13] : memref<3x128xf32, #tpu.memory_space<vmem>>, vector<3x128xf32>
    tpu.vector_store %arg5[%c0_12, %c0_13], %36 {strides = array<i32>} : memref<3x128xf32, #tpu.memory_space<vmem>>, vector<3x128xf32>,
    %c0_i32_14 = arith.constant 0 : i32
    %38 = arith.cmpi eq, %arg1, %c0_i32_14 : i32
    %39 = arith.extui %38 : i1 to i32
    %c0_i32_15 = arith.constant 0 : i32
    %40 = arith.cmpi ne, %39, %c0_i32_15 : i32
    scf.if %40 {
      %c0_16 = arith.constant 0 : index
      %c0_17 = arith.constant 0 : index
      %41 = vector.load %arg5[%c0_16, %c0_17] : memref<3x128xf32, #tpu.memory_space<vmem>>, vector<3x128xf32>
      %c0_18 = arith.constant 0 : index
      %c0_19 = arith.constant 0 : index
      %42 = vector.load %arg4[%c0_18, %c0_19] : memref<3x128xf32, #tpu.memory_space<vmem>>, vector<3x128xf32>
      tpu.vector_store %arg4[%c0_18, %c0_19], %41 {strides = array<i32>} : memref<3x128xf32, #tpu.memory_space<vmem>>, vector<3x128xf32>,
    } else {
    }
    return
  }
  func.func @transform_0(%arg0: i32, %arg1: i32) -> i32 {
    %c0_i32 = arith.constant 0 : i32
    %c0_i32_0 = arith.constant 0 : i32
    return %c0_i32 : i32
  }
  func.func @transform_1(%arg0: i32, %arg1: i32) -> (i32, i32, i32) {
    %c0_i32 = arith.constant 0 : i32
    %c0_i32_0 = arith.constant 0 : i32
    return %arg1, %arg0, %c0_i32 : i32, i32, i32
  }
  func.func @transform_2(%arg0: i32, %arg1: i32) -> (i32, i32) {
    %c0_i32 = arith.constant 0 : i32
    %c0_i32_0 = arith.constant 0 : i32
    return %arg0, %c0_i32 : i32, i32
  }
}

</mosaic_0001>

<bundles_post_ra>
// kernel: template_bank_forward.1
= control target key start
LH: loop header
LB: loop body
LE: loop exit
PB: predicated region body
PF: predicated region fallthrough
CT: control target
= control target key end

     0   :  { %7 = vsyncpa [#allocation4], 0  ;;  %s125_s0 = inlined_call_operand.vmem [shape: f32[4], index: 0, kind: input, shape index: {}]   ;;  %s126_s1 = inlined_call_operand.vmem [shape: f32[4,3,128], index: 1, kind: input, shape index: {}]   ;;  %s127_s2 = inlined_call_operand.vmem [shape: f32[3,128], index: 2, kind: output, shape index: {}]  }
   0x1   :  { %s14_s11 = sshll.u32 %s125_s0, 4  ;;  %s15_s11 = int_to_ptr.vmem [resolvable:$true] %s14_s11 }
   0x2   :  { %s76_s12 = scalar_lea.vmem %s15_s11, 16  ;;  %p81_p1 = scmp.lt.s32.totalorder %s15_s11, %s15_s11 }
   0x3   :  { %p77_p0 = scmp.ne.s32.totalorder %s15_s11, %s76_s12  ;;  %p82_p2 = scmp.lt.s32.totalorder %s76_s12, %s76_s12 }
   0x5   :  { %p83_p3 = por %p82_p2, %p81_p1 }
   0x7   :  { %p84_p4 = pnand %p83_p3, %p77_p0 }
   0x9   :  { %87 = shalt.err (!%p84_p4)
}
   0xa   :  { %s90_s13 = smov [#allocation3]  }
   0xb   :  { %17 = dma.vmem_to_smem %s15_s11, 16, %s90_s13, [#allocation4]  }
   0xc   :  { %88 = dma.done.wait [#allocation4], 16  }
   0xd   :  { %89 = vsyncadd [#allocation4], 4294967280 }
   0xe   :  { %23 = sfence }
   0xf   :  { %s31_s14 = sld [smem:[#allocation3]]  ;;  %v91_v0 = vmov 0.0   ;;  %v32_v1 = vld [vmem:[%s126_s1] sm:$0x7]  ;;  %v69_v2 = vld [vmem:[%s126_s1 + $0x4] sm:$0x7] }
  0x10   :  { %29 = vst [vmem:[#allocation2] sm:$0x7] %v91_v0  ;;  %s68_s15 = sld [smem:[#allocation3 + $0x1]]  ;;  %v71_v4 = vld [vmem:[%s126_s1 + $0x8] sm:$0x7] }
  0x11   :  { %s70_s16 = sld [smem:[#allocation3 + $0x2]]  ;;  %v73_v10 = vld [vmem:[%s126_s1 + $0xc] sm:$0x7] }
  0x12   :  { %s72_s17 = sld [smem:[#allocation3 + $0x3]] }
  0x15   :  { %v33_v3 = vstv %s31_s14 }
  0x16   :  { %v34_v5 = vmul.f32 %v33_v3, %v32_v1  ;;  %v40_v6 = vstv %s68_s15 }
  0x17   :  { %v30_v7 = vld [vmem:[#allocation2] sm:$0x7]  ;;  %v41_v8 = vmul.f32 %v69_v2, %v40_v6  ;;  %v47_v9 = vstv %s70_s16 }
  0x18   :  { %v35_v11 = vadd.f32 %v34_v5, %v30_v7  ;;  %v48_v12 = vmul.f32 %v71_v4, %v47_v9  ;;  %v54_v13 = vstv %s72_s17 }
  0x19   :  { %v55_v15 = vmul.f32 %v73_v10, %v54_v13 }
  0x1a   :  { %v42_v14 = vadd.f32 %v41_v8, %v35_v11 }
  0x1c   :  { %v49_v16 = vadd.f32 %v48_v12, %v42_v14 }
  0x1e   :  { %v56_v17 = vadd.f32 %v55_v15, %v49_v16 }
  0x20   :  { %57 = vst [vmem:[#allocation2] sm:$0x7] %v56_v17 }
  0x27   :  { %v61_v18 = vld [vmem:[#allocation2] sm:$0x7] }
  0x28   :  { %62 = vst [vmem:[%s127_s2] sm:$0x7] %v61_v18 }
  0x29   :  { %67 = vsyncpa [#allocation4], 1 }

</bundles_post_ra>
